<compile_context>
chip_gen: v7x
topology: tpu7x:2x2x1
jax: 0.10.0
libtpu: 0.0.40
codegen_flags: <defaults>
</compile_context>

<pallas_src>
import functools
import math

import jax
import jax.numpy as jnp
from jax import lax
from jax.experimental import pallas as pl
from jax.experimental.pallas import tpu as pltpu

NEG_INF = -1e30


def _round_up(x, m):
    return (x + m - 1) // m * m


def _pad2(a, rows, cols):
    return jnp.pad(a, ((0, rows - a.shape[0]), (0, cols - a.shape[1])))


def _layer_norm_masked(x, gamma, beta, n_true, eps=1e-5):
    # Padded feature columns of x are zero and gamma/beta are zero-padded, so the
    # output stays zero there; statistics use only the n_true real columns
    # (var = E[x^2] - mu^2 with sums over zeros contributing nothing).
    inv_n = 1.0 / float(n_true)
    mu = jnp.sum(x, axis=-1, keepdims=True) * inv_n
    var = jnp.sum(x * x, axis=-1, keepdims=True) * inv_n - mu * mu
    return (x - mu) * lax.rsqrt(var + eps) * gamma + beta


# --------------------------------------------------------------------------
# Pass 1: the three input projections, once per row tile (O(S*h^2) total).
# Per the spec call attention(K, Q, V) -> Attention.forward(Q=K, K=Q, V=V):
#   query proj applied to K, key proj to Q, value proj to V.
# The 1/sqrt(d) scale is pre-folded into Wq/bq by the wrapper.
# --------------------------------------------------------------------------
def projection_kernel(k_ref, q_ref, v_ref,
                      wq_ref, bq_ref, wk_ref, bk_ref, wv_ref, bv_ref,
                      qp_ref, kp_ref, vp_ref):
    qp = jnp.dot(k_ref[...].astype(jnp.bfloat16), wq_ref[...],
                 preferred_element_type=jnp.float32) + bq_ref[...]
    kp = jnp.dot(q_ref[...].astype(jnp.bfloat16), wk_ref[...],
                 preferred_element_type=jnp.float32) + bk_ref[...]
    vp = jnp.dot(v_ref[...].astype(jnp.bfloat16), wv_ref[...],
                 preferred_element_type=jnp.float32) + bv_ref[...]
    qp_ref[...] = qp.astype(qp_ref.dtype)
    kp_ref[...] = kp.astype(kp_ref.dtype)
    vp_ref[...] = vp.astype(vp_ref.dtype)


# --------------------------------------------------------------------------
# Pass 2: flash-style attention over projected tiles + residual/LN1 + FFN +
# residual/LN2, fused per query tile. Grid = (query tiles [parallel],
# kv tiles [arbitrary reduction]).
# --------------------------------------------------------------------------
def encoder_kernel(kres_ref, qp_ref, kp_ref, vp_ref,
                   w1_ref, b1_ref, w2_ref, b2_ref,
                   g1_ref, be1_ref, g2_ref, be2_ref,
                   out_ref,
                   m_scratch, l_scratch, acc_scratch,
                   *, true_seq, true_hidden, seq_pad):
    ki = pl.program_id(1)
    nk = pl.num_programs(1)
    tk = kp_ref.shape[0]

    @pl.when(ki == 0)
    def _():
        m_scratch[...] = jnp.full_like(m_scratch, NEG_INF)
        l_scratch[...] = jnp.zeros_like(l_scratch)
        acc_scratch[...] = jnp.zeros_like(acc_scratch)

    # Scores via contraction over the hidden dim (no explicit transpose).
    # Qp is already bf16 and pre-scaled by 1/sqrt(d).
    s = lax.dot_general(qp_ref[...], kp_ref[...],
                        dimension_numbers=(((1,), (1,)), ((), ())),
                        preferred_element_type=jnp.float32)

    if true_seq < seq_pad:
        # Only the last KV tile can contain padded key rows; skip the
        # iota/compare/select VPU work on every other tile.
        def _mask(sc):
            col = ki * tk + lax.broadcasted_iota(jnp.int32, sc.shape, 1)
            return jnp.where(col < true_seq, sc, NEG_INF)

        s = lax.cond(ki == nk - 1, _mask, lambda sc: sc, s)

    # Online softmax with lane-replicated (tq,128) running max / denominator.
    m_prev = m_scratch[...]
    l_prev = l_scratch[...]
    m_curr = jnp.max(s, axis=-1, keepdims=True)          # (tq, 1)
    m_next = jnp.maximum(m_prev, m_curr)                 # (tq, 128) lane-replicated
    alpha = jnp.exp(m_prev - m_next)                     # (tq, 128)
    p = jnp.exp(s - m_next[:, 0:1])                      # (tq, tk)
    l_scratch[...] = alpha * l_prev + jnp.sum(p, axis=-1, keepdims=True)
    acc_scratch[...] = acc_scratch[...] * alpha[:, 0:1] + jnp.dot(
        p.astype(jnp.bfloat16), vp_ref[...], preferred_element_type=jnp.float32)
    m_scratch[...] = m_next

    @pl.when(ki == nk - 1)
    def _():
        l_final = l_scratch[...]
        attn = acc_scratch[...] * pl.reciprocal(l_final[:, 0:1], approx=True)

        # residual + LayerNorm1 (dropout = identity in eval mode)
        x = kres_ref[...] + attn
        x = _layer_norm_masked(x, g1_ref[...], be1_ref[...], true_hidden)

        # feed-forward: Linear -> ReLU -> (dropout) -> Linear
        h = jnp.dot(x.astype(jnp.bfloat16), w1_ref[...],
                    preferred_element_type=jnp.float32) + b1_ref[...]
        h = jnp.maximum(h, 0.0)
        f = jnp.dot(h.astype(jnp.bfloat16), w2_ref[...],
                    preferred_element_type=jnp.float32) + b2_ref[...]

        # residual + LayerNorm2
        y = x + f
        out_ref[...] = _layer_norm_masked(y, g2_ref[...], be2_ref[...], true_hidden)


def _vmem_limit(nbytes):
    # Budget derived from actual tile/weight sizes with 2x headroom, clamped to
    # a range that is valid on v5e/v6e (128 MiB physical) and conservative for
    # v7x (64 MiB physical).
    return int(min(100 * 1024 * 1024, max(32 * 1024 * 1024, 2 * nbytes)))


def transformer_encoder(K, Q, V, params):
    S, input_dim = K.shape
    hidden_dim = params["wq"].shape[1]
    output_dim = params["w2"].shape[1]
    assert input_dim == hidden_dim, "residual K + attn requires input_dim == hidden_dim"
    assert output_dim == hidden_dim, "residual x + ffn(x) requires output_dim == hidden_dim"

    hpad = _round_up(hidden_dim, 128)        # lane-dense feature dim

    # Tile selection:
    #  * small S: one full-extent tile (blocks equal array dims, any dtype ok)
    #  * long S: tq=128 x tk=256 flash tiles (half the live score-tile vregs of
    #    256x256, 256-wide MXU N dim, and >=2 parallel query tiles for megacore).
    if S <= 128:
        s_pad = _round_up(S, 8)
        tq = tk = s_pad
    else:
        tq, tk = 128, 256
        s_pad = _round_up(S, tk)
    tp = tk                                   # projection row tile (divides s_pad)

    scale = 1.0 / math.sqrt(float(hidden_dim))

    kpad = _pad2(K, s_pad, hpad)
    qpad = _pad2(Q, s_pad, hpad)
    vpad = _pad2(V, s_pad, hpad)

    def wpad(w, s=1.0):
        return (_pad2(w, hpad, hpad) * s).astype(jnp.bfloat16)  # bf16 MXU weights

    def vecpad(b, s=1.0):
        return _pad2(b, 1, hpad) * s                             # f32 biases / LN

    # ---------------- pass 1: projections ----------------
    row = pl.BlockSpec((tp, hpad), lambda i: (i, 0))
    mat1 = pl.BlockSpec((hpad, hpad), lambda i: (0, 0))
    vec1 = pl.BlockSpec((1, hpad), lambda i: (0, 0))

    proj_flops = 2 * s_pad * hpad * hpad * 3
    proj_bytes = (3 * s_pad * hpad * 4 + 3 * hpad * hpad * 2 + 3 * hpad * 4
                  + 3 * s_pad * hpad * 2)
    proj_vmem = (2 * 3 * tp * hpad * 4      # f32 input tiles (double-buffered)
                 + 2 * 3 * hpad * hpad * 2  # bf16 weights
                 + 2 * 3 * hpad * 4         # biases
                 + 2 * 3 * tp * hpad * 2)   # bf16 output tiles

    qp, kp, vp = pl.pallas_call(
        projection_kernel,
        out_shape=(jax.ShapeDtypeStruct((s_pad, hpad), jnp.bfloat16),) * 3,
        grid_spec=pltpu.PrefetchScalarGridSpec(
            num_scalar_prefetch=0,
            grid=(s_pad // tp,),
            in_specs=[row, row, row, mat1, vec1, mat1, vec1, mat1, vec1],
            out_specs=[row, row, row],
        ),
        compiler_params=pltpu.CompilerParams(
            dimension_semantics=("parallel",),
            vmem_limit_bytes=_vmem_limit(proj_vmem),
        ),
        cost_estimate=pl.CostEstimate(flops=proj_flops, transcendentals=0,
                                      bytes_accessed=proj_bytes),
    )(kpad, qpad, vpad,
      wpad(params["wq"], scale), vecpad(params["bq"], scale),   # fold 1/sqrt(d)
      wpad(params["wk"]), vecpad(params["bk"]),
      wpad(params["wv"]), vecpad(params["bv"]))

    # ---------------- pass 2: flash attention + FFN + LayerNorms ----------------
    nq, nk = s_pad // tq, s_pad // tk
    q_row = pl.BlockSpec((tq, hpad), lambda qi, ki: (qi, 0))
    kv_row = pl.BlockSpec((tk, hpad), lambda qi, ki: (ki, 0))
    mat2 = pl.BlockSpec((hpad, hpad), lambda qi, ki: (0, 0))   # FFN weights resident
    vec2 = pl.BlockSpec((1, hpad), lambda qi, ki: (0, 0))

    kernel = functools.partial(
        encoder_kernel, true_seq=S, true_hidden=hidden_dim, seq_pad=s_pad)

    attn_flops = 2 * s_pad * s_pad * hpad * 2 + 2 * s_pad * hpad * hpad * 2
    attn_bytes = (s_pad * hpad * 4                 # K residual (f32, once per qi)
                  + s_pad * hpad * 2               # Qp (bf16, once per qi)
                  + 2 * s_pad * hpad * 2 * nq      # Kp/Vp re-read once per query tile
                  + 2 * hpad * hpad * 2            # FFN weights
                  + 6 * hpad * 4                   # biases / LN params
                  + s_pad * hpad * 4)              # output
    flash_vmem = (2 * tq * hpad * 4                # K residual tile
                  + 2 * tq * hpad * 2              # Qp tile
                  + 2 * 2 * tk * hpad * 2          # Kp / Vp tiles
                  + 2 * 2 * hpad * hpad * 2        # FFN weights (worst-case buffered)
                  + 2 * 6 * hpad * 4               # biases / LN params
                  + 2 * tq * hpad * 4              # output tile
                  + 2 * tq * 128 * 4               # m / l scratch
                  + tq * hpad * 4)                 # acc scratch

    out = pl.pallas_call(
        kernel,
        out_shape=jax.ShapeDtypeStruct((s_pad, hpad), jnp.float32),
        grid_spec=pltpu.PrefetchScalarGridSpec(
            num_scalar_prefetch=0,
            grid=(nq, nk),
            in_specs=[q_row, q_row, kv_row, kv_row,
                      mat2, vec2, mat2, vec2,
                      vec2, vec2, vec2, vec2],
            out_specs=pl.BlockSpec((tq, hpad), lambda qi, ki: (qi, 0)),
            scratch_shapes=[pltpu.VMEM((tq, 128), jnp.float32),   # running max
                            pltpu.VMEM((tq, 128), jnp.float32),   # running denom
                            pltpu.VMEM((tq, hpad), jnp.float32)],  # output acc
        ),
        compiler_params=pltpu.CompilerParams(
            dimension_semantics=("parallel", "arbitrary"),
            vmem_limit_bytes=_vmem_limit(flash_vmem),
        ),
        cost_estimate=pl.CostEstimate(flops=attn_flops, transcendentals=s_pad * s_pad,
                                      bytes_accessed=attn_bytes),
    )(kpad, qp, kp, vp,
      wpad(params["w1"]), vecpad(params["b1"]),
      wpad(params["w2"]), vecpad(params["b2"]),
      vecpad(params["g1"]), vecpad(params["be1"]),
      vecpad(params["g2"]), vecpad(params["be2"]))

    return out[:S, :hidden_dim]


# --------------------------------------------------------------------------
# Pure-JAX reference (f32) for a correctness sanity check.
# --------------------------------------------------------------------------
def transformer_encoder_ref(K, Q, V, params):
    hidden_dim = params["wq"].shape[1]
    qp = K @ params["wq"] + params["bq"]
    kp = Q @ params["wk"] + params["bk"]
    vp = V @ params["wv"] + params["bv"]
    s = (qp @ kp.T) / jnp.sqrt(jnp.float32(hidden_dim))
    attn = jax.nn.softmax(s, axis=-1) @ vp

    def ln(x, g, b, eps=1e-5):
        mu = jnp.mean(x, axis=-1, keepdims=True)
        var = jnp.mean((x - mu) ** 2, axis=-1, keepdims=True)
        return (x - mu) / jnp.sqrt(var + eps) * g + b

    x = ln(K + attn, params["g1"], params["be1"])
    h = jnp.maximum(x @ params["w1"] + params["b1"], 0.0)
    f = h @ params["w2"] + params["b2"]
    return ln(x + f, params["g2"], params["be2"])


def init_params(key, input_dim, hidden_dim, output_dim):
    ks = jax.random.split(key, 10)

    def linear(kw, kb, fan_in, fan_out):
        bound = 1.0 / math.sqrt(fan_in)
        w = jax.random.uniform(kw, (fan_in, fan_out), jnp.float32, -bound, bound)
        b = jax.random.uniform(kb, (1, fan_out), jnp.float32, -bound, bound)
        return w, b

    wq, bq = linear(ks[0], ks[1], input_dim, hidden_dim)
    wk, bk = linear(ks[2], ks[3], input_dim, hidden_dim)
    wv, bv = linear(ks[4], ks[5], input_dim, hidden_dim)
    w1, b1 = linear(ks[6], ks[7], hidden_dim, hidden_dim)
    w2, b2 = linear(ks[8], ks[9], hidden_dim, output_dim)
    return {
        "wq": wq, "bq": bq, "wk": wk, "bk": bk, "wv": wv, "bv": bv,
        "w1": w1, "b1": b1, "w2": w2, "b2": b2,
        "g1": jnp.ones((1, hidden_dim), jnp.float32),
        "be1": jnp.zeros((1, hidden_dim), jnp.float32),
        "g2": jnp.ones((1, hidden_dim), jnp.float32),
        "be2": jnp.zeros((1, hidden_dim), jnp.float32),
    }


if __name__ == "__main__":
    S = 8
    input_dim = 32
    hidden_dim = 32
    output_dim = 32  # must equal hidden_dim for the residual / LayerNorm2

    key = jax.random.PRNGKey(0)
    kK, kQ, kV, kP = jax.random.split(key, 4)
    K = jax.random.normal(kK, (S, input_dim), jnp.float32)
    Q = jax.random.normal(kQ, (S, input_dim), jnp.float32)
    V = jax.random.normal(kV, (S, input_dim), jnp.float32)

    params = init_params(kP, input_dim, hidden_dim, output_dim)

    out = transformer_encoder(K, Q, V, params)
    jax.block_until_ready(out)
    assert out.shape == (S, hidden_dim)
    assert bool(jnp.all(jnp.isfinite(out)))

    ref = transformer_encoder_ref(K, Q, V, params)
    max_err = float(jnp.max(jnp.abs(out - ref)))
    # bf16 MXU operands + approx reciprocal -> loose tolerance.
    assert max_err < 5e-2, f"max abs err {max_err}"
    print("KERNEL_OK")
</pallas_src>

<mosaic_0001>
module attributes {stable_mosaic.version = 11 : i64} {
  func.func @projection_kernel(%arg0: i32, %arg1: memref<8x128xf32, #tpu.memory_space<vmem>>, %arg2: memref<8x128xf32, #tpu.memory_space<vmem>>, %arg3: memref<8x128xf32, #tpu.memory_space<vmem>>, %arg4: memref<128x128xbf16, #tpu.memory_space<vmem>>, %arg5: memref<1x128xf32, #tpu.memory_space<vmem>>, %arg6: memref<128x128xbf16, #tpu.memory_space<vmem>>, %arg7: memref<1x128xf32, #tpu.memory_space<vmem>>, %arg8: memref<128x128xbf16, #tpu.memory_space<vmem>>, %arg9: memref<1x128xf32, #tpu.memory_space<vmem>>, %arg10: memref<8x128xbf16, #tpu.memory_space<vmem>>, %arg11: memref<8x128xbf16, #tpu.memory_space<vmem>>, %arg12: memref<8x128xbf16, #tpu.memory_space<vmem>>) attributes {dimension_semantics = [#tpu.dimension_semantics<parallel>], iteration_bounds = array<i64: 1>, scalar_prefetch = 0 : i64, scratch_operands = 0 : i64, tpu.core_type = #tpu.core_type<tc>, window_params = [{transform_indices = @transform_0, window_bounds = array<i64: 8, 128>}, {transform_indices = @transform_1, window_bounds = array<i64: 8, 128>}, {transform_indices = @transform_2, window_bounds = array<i64: 8, 128>}, {pipeline_mode = #tpu.pipeline_mode<synchronous>, transform_indices = @transform_3, window_bounds = array<i64: 128, 128>}, {pipeline_mode = #tpu.pipeline_mode<synchronous>, transform_indices = @transform_4, window_bounds = array<i64: 1, 128>}, {pipeline_mode = #tpu.pipeline_mode<synchronous>, transform_indices = @transform_5, window_bounds = array<i64: 128, 128>}, {pipeline_mode = #tpu.pipeline_mode<synchronous>, transform_indices = @transform_6, window_bounds = array<i64: 1, 128>}, {pipeline_mode = #tpu.pipeline_mode<synchronous>, transform_indices = @transform_7, window_bounds = array<i64: 128, 128>}, {pipeline_mode = #tpu.pipeline_mode<synchronous>, transform_indices = @transform_8, window_bounds = array<i64: 1, 128>}, {transform_indices = @transform_9, window_bounds = array<i64: 8, 128>}, {transform_indices = @transform_10, window_bounds = array<i64: 8, 128>}, {transform_indices = @transform_11, window_bounds = array<i64: 8, 128>}]} {
    %c0 = arith.constant 0 : index
    %c0_0 = arith.constant 0 : index
    %0 = vector.load %arg1[%c0, %c0_0] : memref<8x128xf32, #tpu.memory_space<vmem>>, vector<8x128xf32>
    %1 = arith.truncf %0 : vector<8x128xf32> to vector<8x128xbf16>
    %c0_1 = arith.constant 0 : index
    %c0_2 = arith.constant 0 : index
    %2 = vector.load %arg4[%c0_1, %c0_2] : memref<128x128xbf16, #tpu.memory_space<vmem>>, vector<128x128xbf16>
    %cst = arith.constant dense<0.000000e+00> : vector<8x128xf32>
    %3 = tpu.matmul %1, %2, %cst {dimension_numbers = #tpu.dot_dimension_numbers<[1], [0], [0], [1], [0, 0, 1, 1], [], []>} : vector<8x128xbf16>, vector<128x128xbf16>, vector<8x128xf32> -> vector<8x128xf32>
    %c0_3 = arith.constant 0 : index
    %c0_4 = arith.constant 0 : index
    %4 = vector.load %arg5[%c0_3, %c0_4] : memref<1x128xf32, #tpu.memory_space<vmem>>, vector<1x128xf32>
    %5 = vector.broadcast %4 : vector<1x128xf32> to vector<8x128xf32>
    %6 = arith.addf %3, %5 : vector<8x128xf32>
    %c0_5 = arith.constant 0 : index
    %c0_6 = arith.constant 0 : index
    %7 = vector.load %arg2[%c0_5, %c0_6] : memref<8x128xf32, #tpu.memory_space<vmem>>, vector<8x128xf32>
    %8 = arith.truncf %7 : vector<8x128xf32> to vector<8x128xbf16>
    %c0_7 = arith.constant 0 : index
    %c0_8 = arith.constant 0 : index
    %9 = vector.load %arg6[%c0_7, %c0_8] : memref<128x128xbf16, #tpu.memory_space<vmem>>, vector<128x128xbf16>
    %cst_9 = arith.constant dense<0.000000e+00> : vector<8x128xf32>
    %10 = tpu.matmul %8, %9, %cst_9 {dimension_numbers = #tpu.dot_dimension_numbers<[1], [0], [0], [1], [0, 0, 1, 1], [], []>} : vector<8x128xbf16>, vector<128x128xbf16>, vector<8x128xf32> -> vector<8x128xf32>
    %c0_10 = arith.constant 0 : index
    %c0_11 = arith.constant 0 : index
    %11 = vector.load %arg7[%c0_10, %c0_11] : memref<1x128xf32, #tpu.memory_space<vmem>>, vector<1x128xf32>
    %12 = vector.broadcast %11 : vector<1x128xf32> to vector<8x128xf32>
    %13 = arith.addf %10, %12 : vector<8x128xf32>
    %c0_12 = arith.constant 0 : index
    %c0_13 = arith.constant 0 : index
    %14 = vector.load %arg3[%c0_12, %c0_13] : memref<8x128xf32, #tpu.memory_space<vmem>>, vector<8x128xf32>
    %15 = arith.truncf %14 : vector<8x128xf32> to vector<8x128xbf16>
    %c0_14 = arith.constant 0 : index
    %c0_15 = arith.constant 0 : index
    %16 = vector.load %arg8[%c0_14, %c0_15] : memref<128x128xbf16, #tpu.memory_space<vmem>>, vector<128x128xbf16>
    %cst_16 = arith.constant dense<0.000000e+00> : vector<8x128xf32>
    %17 = tpu.matmul %15, %16, %cst_16 {dimension_numbers = #tpu.dot_dimension_numbers<[1], [0], [0], [1], [0, 0, 1, 1], [], []>} : vector<8x128xbf16>, vector<128x128xbf16>, vector<8x128xf32> -> vector<8x128xf32>
    %c0_17 = arith.constant 0 : index
    %c0_18 = arith.constant 0 : index
    %18 = vector.load %arg9[%c0_17, %c0_18] : memref<1x128xf32, #tpu.memory_space<vmem>>, vector<1x128xf32>
    %19 = vector.broadcast %18 : vector<1x128xf32> to vector<8x128xf32>
    %20 = arith.addf %17, %19 : vector<8x128xf32>
    %21 = arith.truncf %6 : vector<8x128xf32> to vector<8x128xbf16>
    %c0_19 = arith.constant 0 : index
    %c0_20 = arith.constant 0 : index
    %22 = vector.load %arg10[%c0_19, %c0_20] : memref<8x128xbf16, #tpu.memory_space<vmem>>, vector<8x128xbf16>
    tpu.vector_store %arg10[%c0_19, %c0_20], %21 {strides = array<i32>} : memref<8x128xbf16, #tpu.memory_space<vmem>>, vector<8x128xbf16>,
    %23 = arith.truncf %13 : vector<8x128xf32> to vector<8x128xbf16>
    %c0_21 = arith.constant 0 : index
    %c0_22 = arith.constant 0 : index
    %24 = vector.load %arg11[%c0_21, %c0_22] : memref<8x128xbf16, #tpu.memory_space<vmem>>, vector<8x128xbf16>
    tpu.vector_store %arg11[%c0_21, %c0_22], %23 {strides = array<i32>} : memref<8x128xbf16, #tpu.memory_space<vmem>>, vector<8x128xbf16>,
    %25 = arith.truncf %20 : vector<8x128xf32> to vector<8x128xbf16>
    %c0_23 = arith.constant 0 : index
    %c0_24 = arith.constant 0 : index
    %26 = vector.load %arg12[%c0_23, %c0_24] : memref<8x128xbf16, #tpu.memory_space<vmem>>, vector<8x128xbf16>
    tpu.vector_store %arg12[%c0_23, %c0_24], %25 {strides = array<i32>} : memref<8x128xbf16, #tpu.memory_space<vmem>>, vector<8x128xbf16>,
    return
  }
  func.func @transform_0(%arg0: i32) -> (i32, i32) {
    %c0_i32 = arith.constant 0 : i32
    %c0_i32_0 = arith.constant 0 : i32
    return %arg0, %c0_i32 : i32, i32
  }
  func.func @transform_1(%arg0: i32) -> (i32, i32) {
    %c0_i32 = arith.constant 0 : i32
    %c0_i32_0 = arith.constant 0 : i32
    return %arg0, %c0_i32 : i32, i32
  }
  func.func @transform_2(%arg0: i32) -> (i32, i32) {
    %c0_i32 = arith.constant 0 : i32
    %c0_i32_0 = arith.constant 0 : i32
    return %arg0, %c0_i32 : i32, i32
  }
  func.func @transform_3(%arg0: i32) -> (i32, i32) {
    %c0_i32 = arith.constant 0 : i32
    %c0_i32_0 = arith.constant 0 : i32
    %c0_i32_1 = arith.constant 0 : i32
    return %c0_i32, %c0_i32_0 : i32, i32
  }
  func.func @transform_4(%arg0: i32) -> (i32, i32) {
    %c0_i32 = arith.constant 0 : i32
    %c0_i32_0 = arith.constant 0 : i32
    %c0_i32_1 = arith.constant 0 : i32
    return %c0_i32, %c0_i32_0 : i32, i32
  }
  func.func @transform_5(%arg0: i32) -> (i32, i32) {
    %c0_i32 = arith.constant 0 : i32
    %c0_i32_0 = arith.constant 0 : i32
    %c0_i32_1 = arith.constant 0 : i32
    return %c0_i32, %c0_i32_0 : i32, i32
  }
  func.func @transform_6(%arg0: i32) -> (i32, i32) {
    %c0_i32 = arith.constant 0 : i32
    %c0_i32_0 = arith.constant 0 : i32
    %c0_i32_1 = arith.constant 0 : i32
    return %c0_i32, %c0_i32_0 : i32, i32
  }
  func.func @transform_7(%arg0: i32) -> (i32, i32) {
    %c0_i32 = arith.constant 0 : i32
    %c0_i32_0 = arith.constant 0 : i32
    %c0_i32_1 = arith.constant 0 : i32
    return %c0_i32, %c0_i32_0 : i32, i32
  }
  func.func @transform_8(%arg0: i32) -> (i32, i32) {
    %c0_i32 = arith.constant 0 : i32
    %c0_i32_0 = arith.constant 0 : i32
    %c0_i32_1 = arith.constant 0 : i32
    return %c0_i32, %c0_i32_0 : i32, i32
  }
  func.func @transform_9(%arg0: i32) -> (i32, i32) {
    %c0_i32 = arith.constant 0 : i32
    %c0_i32_0 = arith.constant 0 : i32
    return %arg0, %c0_i32 : i32, i32
  }
  func.func @transform_10(%arg0: i32) -> (i32, i32) {
    %c0_i32 = arith.constant 0 : i32
    %c0_i32_0 = arith.constant 0 : i32
    return %arg0, %c0_i32 : i32, i32
  }
  func.func @transform_11(%arg0: i32) -> (i32, i32) {
    %c0_i32 = arith.constant 0 : i32
    %c0_i32_0 = arith.constant 0 : i32
    return %arg0, %c0_i32 : i32, i32
  }
}

</mosaic_0001>

<bundles_post_ra>
// kernel: tpu_custom_call.1
= control target key start
LH: loop header
LB: loop body
LE: loop exit
PB: predicated region body
PF: predicated region fallthrough
CT: control target
= control target key end

     0   :  { %17 = vsyncpa [#allocation3], 0  ;;  %s1108_s0 = inlined_call_operand.hbm [shape: f32[8,128], index: 0, kind: input, shape index: {}]   ;;  %s1109_s1 = inlined_call_operand.hbm [shape: f32[8,128], index: 1, kind: input, shape index: {}]   ;;  %s1110_s2 = inlined_call_operand.hbm [shape: f32[8,128], index: 2, kind: input, shape index: {}]   ;;  %s1111_s3 = inlined_call_operand.hbm [shape: bf16[128,128], index: 3, kind: input, shape index: {}]   ;;  %s1112_s4 = inlined_call_operand.vmem [shape: f32[1,128], index: 4, kind: input, shape index: {}]   ;;  %s1113_s5 = inlined_call_operand.hbm [shape: bf16[128,128], index: 5, kind: input, shape index: {}]   ;;  %s1114_s6 = inlined_call_operand.vmem [shape: f32[1,128], index: 6, kind: input, shape index: {}]   ;;  %s1115_s7 = inlined_call_operand.hbm [shape: bf16[128,128], index: 7, kind: input, shape index: {}]   ;;  %s1116_s8 = inlined_call_operand.vmem [shape: f32[1,128], index: 8, kind: input, shape index: {}]   ;;  %s1117_s9 = inlined_call_operand.hbm [shape: bf16[8,128], index: 9, kind: output, shape index: {0}]   ;;  %s1118_s10 = inlined_call_operand.hbm [shape: bf16[8,128], index: 10, kind: output, shape index: {1}]   ;;  %s1119_s11 = inlined_call_operand.hbm [shape: bf16[8,128], index: 11, kind: output, shape index: {2}]  }
   0x1   :  { %18 = vsyncpa [#allocation6], 0 }
   0x2   :  { %19 = vsyncpa [#allocation9], 0 }
   0x3   :  { %20 = vsyncpa [#allocation12], 0 }
   0x4   :  { %21 = vsyncpa [#allocation4], 0 }
   0x5   :  { %22 = vsyncpa [#allocation15], 0  ;;  %s865_s17 = smov [#allocation5]   ;;  %s866_s19 = smov [#allocation8]  }
   0x6   :  { %s39_s18 = sshll.u32 %s865_s17, 4  ;;  %s58_s20 = sshll.u32 %s866_s19, 4  ;;  %s40_s18 = int_to_ptr.vmem [resolvable:$true] %s39_s18  ;;  %s938_s20 = int_to_ptr.vmem [resolvable:$true] %s58_s20 }
   0x7   :  { %s655_s23 = scalar_lea.hbm %s1109_s1, 128 }
   0x8   :  { %p656_p0 = scmp.ne.s32.totalorder %s1109_s1, %s655_s23  ;;  %p659_p1 = scmp.lt.u32.totalorder %s655_s23, %s1109_s1 }
   0xa   :  { %p661_p2 = pnand %p659_p1, %p656_p0 }
   0xc   :  { %664 = shalt.err (!%p661_p2)
}
   0xd   :  { %s665_s28 = scalar_lea.vmem %s40_s18, 128  ;;  %p670_p4 = scmp.lt.s32.totalorder %s40_s18, %s40_s18 }
   0xe   :  { %p666_p3 = scmp.ne.s32.totalorder %s40_s18, %s665_s28  ;;  %p671_p5 = scmp.lt.s32.totalorder %s665_s28, %s665_s28 }
  0x10   :  { %p672_p6 = por %p671_p5, %p670_p4 }
  0x12   :  { %p673_p7 = pnand %p672_p6, %p666_p3 }
  0x14   :  { %676 = shalt.err (!%p673_p7)
}
  0x15   :  { %42 = dma.hbm_to_vmem [thread:$0]  %s1109_s1, 128, %s40_s18, [#allocation6]  }
  0x16   :  { %s677_s14 = scalar_lea.hbm %s1111_s3, 1024 }
  0x17   :  { %p678_p8 = scmp.ne.s32.totalorder %s1111_s3, %s677_s14  ;;  %p681_p9 = scmp.lt.u32.totalorder %s677_s14, %s1111_s3 }
  0x19   :  { %p683_p10 = pnand %p681_p9, %p678_p8 }
  0x1b   :  { %686 = shalt.err (!%p683_p10)
}
  0x1c   :  { %s687_s21 = scalar_lea.vmem %s938_s20, 1024  ;;  %p692_p12 = scmp.lt.s32.totalorder %s938_s20, %s938_s20 }
  0x1d   :  { %p688_p11 = scmp.ne.s32.totalorder %s938_s20, %s687_s21  ;;  %p693_p13 = scmp.lt.s32.totalorder %s687_s21, %s687_s21 }
  0x1f   :  { %p694_p0 = por %p693_p13, %p692_p12 }
  0x21   :  { %p695_p1 = pnand %p694_p0, %p688_p11 }
  0x23   :  { %698 = shalt.err (!%p695_p1)
}
  0x24   :  { %s867_s1 = smov 64   ;;  %s868_s18 = smov 4  }
  0x25   :  { %64 = dma.hbm_to_vmem [thread:$0]  %s1111_s3, 1024, %s938_s20, [#allocation9], %s867_s1, %s867_s1, %s868_s18  }
  0x26   :  { %s869_s24 = smov [#allocation2]   ;;  %s870_s26 = smov [#allocation7]  }
  0x27   :  { %s29_s25 = sshll.u32 %s869_s24, 4  ;;  %s49_s27 = sshll.u32 %s870_s26, 4  ;;  %s30_s25 = int_to_ptr.vmem [resolvable:$true] %s29_s25  ;;  %s50_s27 = int_to_ptr.vmem [resolvable:$true] %s49_s27 }
  0x28   :  { %s699_s30 = scalar_lea.hbm %s1108_s0, 128 }
  0x29   :  { %p700_p2 = scmp.ne.s32.totalorder %s1108_s0, %s699_s30  ;;  %p703_p3 = scmp.lt.u32.totalorder %s699_s30, %s1108_s0 }
  0x2b   :  { %p705_p4 = pnand %p703_p3, %p700_p2 }
  0x2d   :  { %708 = shalt.err (!%p705_p4)
}
  0x2e   :  { %s709_s3 = scalar_lea.vmem %s30_s25, 128  ;;  %p714_p6 = scmp.lt.s32.totalorder %s30_s25, %s30_s25 }
  0x2f   :  { %p710_p5 = scmp.ne.s32.totalorder %s30_s25, %s709_s3  ;;  %p715_p7 = scmp.lt.s32.totalorder %s709_s3, %s709_s3 }
  0x31   :  { %p716_p8 = por %p715_p7, %p714_p6 }
  0x33   :  { %p717_p9 = pnand %p716_p8, %p710_p5 }
  0x35   :  { %720 = shalt.err (!%p717_p9)
}
  0x36   :  { %32 = dma.hbm_to_vmem [thread:$0]  %s1108_s0, 128, %s30_s25, [#allocation3]  }
  0x37   :  { %s721_s21 = scalar_lea.hbm %s1110_s2, 128 }
  0x38   :  { %p722_p10 = scmp.ne.s32.totalorder %s1110_s2, %s721_s21  ;;  %p725_p11 = scmp.lt.u32.totalorder %s721_s21, %s1110_s2 }
  0x3a   :  { %p727_p12 = pnand %p725_p11, %p722_p10 }
  0x3c   :  { %730 = shalt.err (!%p727_p12)
}
  0x3d   :  { %s731_s28 = scalar_lea.vmem %s50_s27, 128  ;;  %p736_p0 = scmp.lt.s32.totalorder %s50_s27, %s50_s27 }
  0x3e   :  { %p732_p13 = scmp.ne.s32.totalorder %s50_s27, %s731_s28  ;;  %p737_p1 = scmp.lt.s32.totalorder %s731_s28, %s731_s28 }
  0x40   :  { %p738_p2 = por %p737_p1, %p736_p0 }
  0x42   :  { %p739_p3 = pnand %p738_p2, %p732_p13 }
  0x44   :  { %742 = shalt.err (!%p739_p3)
}
  0x45   :  { %52 = dma.hbm_to_vmem [thread:$0]  %s1110_s2, 128, %s50_s27, [#allocation6]  }
  0x46   :  { %s871_s29 = smov [#allocation10]   ;;  %s872_s12 = smov [#allocation11]  }
  0x47   :  { %s72_s30 = sshll.u32 %s871_s29, 4  ;;  %s86_s13 = sshll.u32 %s872_s12, 4  ;;  %s73_s30 = int_to_ptr.vmem [resolvable:$true] %s72_s30  ;;  %s996_s13 = int_to_ptr.vmem [resolvable:$true] %s86_s13 }
  0x48   :  { %s743_s3 = scalar_lea.hbm %s1113_s5, 1024 }
  0x49   :  { %p744_p4 = scmp.ne.s32.totalorder %s1113_s5, %s743_s3  ;;  %p747_p5 = scmp.lt.u32.totalorder %s743_s3, %s1113_s5 }
  0x4b   :  { %p749_p6 = pnand %p747_p5, %p744_p4 }
  0x4d   :  { %752 = shalt.err (!%p749_p6)
}
  0x4e   :  { %s753_s2 = scalar_lea.vmem %s73_s30, 1024  ;;  %p758_p8 = scmp.lt.s32.totalorder %s73_s30, %s73_s30 }
  0x4f   :  { %p754_p7 = scmp.ne.s32.totalorder %s73_s30, %s753_s2  ;;  %p759_p9 = scmp.lt.s32.totalorder %s753_s2, %s753_s2 }
  0x51   :  { %p760_p10 = por %p759_p9, %p758_p8 }
  0x53   :  { %p761_p11 = pnand %p760_p10, %p754_p7 }
  0x55   :  { %764 = shalt.err (!%p761_p11)
}
  0x56   :  { %78 = dma.hbm_to_vmem [thread:$0]  %s1113_s5, 1024, %s73_s30, [#allocation9], %s867_s1, %s867_s1, %s868_s18  }
  0x57   :  { %s765_s24 = scalar_lea.hbm %s1115_s7, 1024 }
  0x58   :  { %p766_p12 = scmp.ne.s32.totalorder %s1115_s7, %s765_s24  ;;  %p769_p13 = scmp.lt.u32.totalorder %s765_s24, %s1115_s7 }
  0x5a   :  { %p771_p0 = pnand %p769_p13, %p766_p12 }
  0x5c   :  { %774 = shalt.err (!%p771_p0)
}
  0x5d   :  { %s775_s29 = scalar_lea.vmem %s996_s13, 1024  ;;  %p780_p2 = scmp.lt.s32.totalorder %s996_s13, %s996_s13 }
  0x5e   :  { %p776_p1 = scmp.ne.s32.totalorder %s996_s13, %s775_s29  ;;  %p781_p3 = scmp.lt.s32.totalorder %s775_s29, %s775_s29 }
  0x60   :  { %p782_p4 = por %p781_p3, %p780_p2 }
  0x62   :  { %p783_p5 = pnand %p782_p4, %p776_p1 }
  0x64   :  { %786 = shalt.err (!%p783_p5)
}
  0x65   :  { %92 = dma.hbm_to_vmem [thread:$0]  %s1115_s7, 1024, %s996_s13, [#allocation12], %s867_s1, %s867_s1, %s868_s18  }
  0x66   :  { %853 = dma.done.wait [#allocation3], 128  }
  0x67   :  { %854 = vsyncadd [#allocation3], 4294967168 }
  0x68   :  { %855 = dma.done.wait [#allocation6], 256  }
  0x69   :  { %856 = vsyncadd [#allocation6], 4294967040 }
  0x6a   :  { %857 = dma.done.wait [#allocation9], 2048  }
  0x6b   :  { %858 = vsyncadd [#allocation9], 4294965248 }
  0x6c   :  { %859 = dma.done.wait [#allocation12], 1024  }
  0x6d   :  { %860 = vsyncadd [#allocation12], 4294966272  ;;  %v873_v0 = vmov 0.0   ;;  %vm874_vm0 = vmmov 0   ;;  %v631_v1 = vld [vmem:[#allocation8] sm:$0xff]   ;;  %v632_v2 = vld [vmem:[#allocation8 + $0x8] sm:$0xff]  }
  0x6e   :  { %558 = vmatprep.subr.bf16.mxu0 %v873_v0  ;;  %578 = vmatprep.subr.bf16.mxu1 %v873_v0  ;;  %v633_v3 = vld [vmem:[#allocation8 + $0x10] sm:$0xff]   ;;  %v639_v4 = vld [vmem:[#allocation10] sm:$0xff]   ;;  %v634_v5 = vld [vmem:[#allocation8 + $0x18] sm:$0xff]   ;;  %s875_s18 = smov [#allocation13]  }
  0x6f   :  { %574 = vmatprep.mubr.msk.bf16.mxu0 %vm874_vm0, %v873_v0  ;;  %594 = vmatprep.mubr.msk.bf16.mxu1 %vm874_vm0, %v873_v0  ;;  %v640_v6 = vld [vmem:[#allocation10 + $0x8] sm:$0xff]   ;;  %v635_v7 = vld [vmem:[#allocation8 + $0x20] sm:$0xff]   ;;  %v642_v8 = vld [vmem:[#allocation10 + $0x10] sm:$0xff]   ;;  %s465_s12 = sshll.u32 %s875_s18, 4  ;;  %s466_s12 = int_to_ptr.vmem [resolvable:$true] %s465_s12 }
  0x70   :  { %559 = vmatpush3.bf16.msra.mxu0 %v631_v1  ;;  %579 = vmatpush3.bf16.msra.mxu1 %v639_v4  ;;  %v636_v9 = vld [vmem:[#allocation8 + $0x28] sm:$0xff]   ;;  %v644_v10 = vld [vmem:[#allocation10 + $0x18] sm:$0xff]   ;;  %v637_v11 = vld [vmem:[#allocation8 + $0x30] sm:$0xff]   ;;  %s787_s15 = scalar_lea.vmem %s466_s12, 64  ;;  %p792_p7 = scmp.lt.s32.totalorder %s466_s12, %s466_s12 }
  0x71   :  { %560 = vmatprep.subr.bf16.mxu0 %v873_v0  ;;  %580 = vmatprep.subr.bf16.mxu1 %v873_v0  ;;  %v646_v12 = vld [vmem:[#allocation10 + $0x20] sm:$0xff]   ;;  %v638_v13 = vld [vmem:[#allocation8 + $0x38] sm:$0xff]   ;;  %v114_v14 = vld [vmem:[#allocation2] sm:$0xff]  ;;  %p788_p6 = scmp.ne.s32.totalorder %s466_s12, %s787_s15  ;;  %p793_p8 = scmp.lt.s32.totalorder %s787_s15, %s787_s15 }
  0x72   :  { %v648_v15 = vld [vmem:[#allocation10 + $0x28] sm:$0xff]   ;;  %v115_v16 = vpack.c.bf16 %v114_v14, %v114_v14  ;;  %v641_v17 = vld [vmem:[#allocation11] sm:$0xff]   ;;  %v650_v18 = vld [vmem:[#allocation10 + $0x30] sm:$0xff]  }
  0x73   :  { %v643_v19 = vld [vmem:[#allocation11 + $0x8] sm:$0xff]   ;;  %v652_v20 = vld [vmem:[#allocation10 + $0x38] sm:$0xff]   ;;  %v227_v21 = vld [vmem:[#allocation5] sm:$0xff]  ;;  %p794_p9 = por %p793_p8, %p792_p7 }
  0x74   :  { %561 = vmatpush3.bf16.msra.mxu0 %v632_v2  ;;  %581 = vmatpush3.bf16.msra.mxu1 %v640_v6  ;;  %v228_v22 = vpack.c.bf16 %v227_v21, %v227_v21  ;;  %v645_v23 = vld [vmem:[#allocation11 + $0x10] sm:$0xff]   ;;  %v647_v24 = vld [vmem:[#allocation11 + $0x18] sm:$0xff]   ;;  %v649_v25 = vld [vmem:[#allocation11 + $0x20] sm:$0xff]  }
  0x75   :  { %562 = vmatprep.subr.bf16.mxu0 %v873_v0  ;;  %582 = vmatprep.subr.bf16.mxu1 %v873_v0  ;;  %v651_v26 = vld [vmem:[#allocation11 + $0x28] sm:$0xff]   ;;  %v653_v27 = vld [vmem:[#allocation11 + $0x30] sm:$0xff]   ;;  %v654_v28 = vld [vmem:[#allocation11 + $0x38] sm:$0xff]   ;;  %p795_p10 = pnand %p794_p9, %p788_p6 }
  0x76   :  { %v340_v29 = vld [vmem:[#allocation7] sm:$0xff]  ;;  %v504_v31 = vld [vmem:[%s1112_s4] ss:$0 sm:$0xff] }
  0x77   :  { %v341_v30 = vpack.c.bf16 %v340_v29, %v340_v29  ;;  %v513_v38 = vld [vmem:[%s1114_s6] ss:$0 sm:$0xff] }
  0x78   :  { %563 = vmatpush3.bf16.msra.mxu0 %v633_v3  ;;  %583 = vmatpush3.bf16.msra.mxu1 %v642_v8 }
  0x79   :  { %564 = vmatprep.subr.bf16.mxu0 %v873_v0  ;;  %584 = vmatprep.subr.bf16.mxu1 %v873_v0 }
  0x7c   :  { %565 = vmatpush3.bf16.msra.mxu0 %v634_v5  ;;  %585 = vmatpush3.bf16.msra.mxu1 %v644_v10 }
  0x7d   :  { %566 = vmatprep.subr.bf16.mxu0 %v873_v0  ;;  %586 = vmatprep.subr.bf16.mxu1 %v873_v0 }
  0x80   :  { %567 = vmatpush3.bf16.msra.mxu0 %v635_v7  ;;  %587 = vmatpush3.bf16.msra.mxu1 %v646_v12 }
  0x81   :  { %568 = vmatprep.subr.bf16.mxu0 %v873_v0  ;;  %588 = vmatprep.subr.bf16.mxu1 %v873_v0 }
  0x84   :  { %569 = vmatpush3.bf16.msra.mxu0 %v636_v9  ;;  %589 = vmatpush3.bf16.msra.mxu1 %v648_v15 }
  0x85   :  { %570 = vmatprep.subr.bf16.mxu0 %v873_v0  ;;  %590 = vmatprep.subr.bf16.mxu1 %v873_v0 }
  0x88   :  { %571 = vmatpush3.bf16.msra.mxu0 %v637_v11  ;;  %591 = vmatpush3.bf16.msra.mxu1 %v650_v18 }
  0x89   :  { %572 = vmatprep.subr.bf16.mxu0 %v873_v0  ;;  %592 = vmatprep.subr.bf16.mxu1 %v873_v0 }
  0x8c   :  { %573 = vmatpush3.bf16.msra.mxu0 %v638_v13  ;;  %593 = vmatpush3.bf16.msra.mxu1 %v652_v20 }
  0x8d   :  { %598 = vmatprep.subr.bf16.mxu0 %v873_v0 }
  0x8f   :  { %575 = vmatmul.mubr.bf16.vlgmr.msra.gmra.mrb[0].mxu0 %v115_v16  ;;  %595 = vmatmul.mubr.bf16.vlgmr.msra.gmra.mrb[0].mxu1 %v228_v22 }
  0x90   :  { %599 = vmatpush3.bf16.msra.mxu0 %v641_v17  ;;  %614 = vmatprep.mubr.msk.bf16.mxu0 %vm874_vm0, %v873_v0 }
  0x91   :  { %600 = vmatprep.subr.bf16.mxu0 %v873_v0 }
  0x94   :  { %601 = vmatpush3.bf16.msra.mxu0 %v643_v19 }
  0x95   :  { %602 = vmatprep.subr.bf16.mxu0 %v873_v0 }
  0x98   :  { %603 = vmatpush3.bf16.msra.mxu0 %v645_v23 }
  0x99   :  { %604 = vmatprep.subr.bf16.mxu0 %v873_v0 }
  0x9c   :  { %605 = vmatpush3.bf16.msra.mxu0 %v647_v24 }
  0x9d   :  { %606 = vmatprep.subr.bf16.mxu0 %v873_v0 }
  0xa0   :  { %607 = vmatpush3.bf16.msra.mxu0 %v649_v25 }
  0xa1   :  { %608 = vmatprep.subr.bf16.mxu0 %v873_v0 }
  0xa4   :  { %609 = vmatpush3.bf16.msra.mxu0 %v651_v26 }
  0xa5   :  { %610 = vmatprep.subr.bf16.mxu0 %v873_v0 }
  0xa8   :  { %611 = vmatpush3.bf16.msra.mxu0 %v653_v27 }
  0xa9   :  { %612 = vmatprep.subr.bf16.mxu0 %v873_v0 }
  0xac   :  { %613 = vmatpush3.bf16.msra.mxu0 %v654_v28 }
  0xaf   :  { %615 = vmatmul.mubr.bf16.vlgmr.msra.gmra.mrb[4].mxu0 %v341_v30 }
 0x162   :  { %v221_v32 = vpop.f32.mrb[0].mxu0 }
 0x163   :  { %v222_v33 = vadd.f32 %v504_v31, %v221_v32  ;;  %v576_v34 = vpop.f32.mrb[1].mxu0 }
 0x164   :  { %v224_v35 = vpop.f32.mrb[2].mxu0 }
 0x165   :  { %v453_v36 = vpack.c.bf16 %v222_v33, %v222_v33  ;;  %v577_v37 = vpop.f32.mrb[3].mxu0 }
 0x167   :  { %454 = vst [vmem:[#allocation13] sm:$0xf] %v453_v36 }
 0x168   :  { %798 = shalt.err (!%p795_p10)
}
 0x169   :  { %s799_s20 = scalar_lea.hbm %s1117_s9, 64 }
 0x16a   :  { %p800_p11 = scmp.ne.s32.totalorder %s1117_s9, %s799_s20  ;;  %p803_p12 = scmp.lt.u32.totalorder %s799_s20, %s1117_s9 }
 0x16c   :  { %p805_p13 = pnand %p803_p12, %p800_p11 }
 0x16e   :  { %808 = shalt.err (!%p805_p13)
}
 0x16f   :  { %468 = dma.vmem_to_hbm [thread:$0]  %s466_s12, 64, %s1117_s9, [#allocation4]   ;;  %v334_v39 = vpop.f32.mrb[0].mxu1 }
 0x170   :  { %s876_s21 = smov [#allocation14]   ;;  %v335_v40 = vadd.f32 %v513_v38, %v334_v39  ;;  %v596_v41 = vpop.f32.mrb[1].mxu1 }
 0x171   :  { %s475_s22 = sshll.u32 %s876_s21, 4  ;;  %v337_v42 = vpop.f32.mrb[2].mxu1  ;;  %s476_s22 = int_to_ptr.vmem [resolvable:$true] %s475_s22 }
 0x172   :  { %v455_v43 = vpack.c.bf16 %v335_v40, %v335_v40  ;;  %v597_v44 = vpop.f32.mrb[3].mxu1  ;;  %s809_s23 = scalar_lea.vmem %s476_s22, 64  ;;  %p814_p1 = scmp.lt.s32.totalorder %s476_s22, %s476_s22 }
 0x173   :  { %p810_p0 = scmp.ne.s32.totalorder %s476_s22, %s809_s23  ;;  %p815_p2 = scmp.lt.s32.totalorder %s809_s23, %s809_s23 }
 0x174   :  { %456 = vst [vmem:[#allocation14] sm:$0xf] %v455_v43 }
 0x175   :  { %p816_p3 = por %p815_p2, %p814_p1 }
 0x177   :  { %p817_p4 = pnand %p816_p3, %p810_p0 }
 0x179   :  { %820 = shalt.err (!%p817_p4)
}
 0x17a   :  { %s821_s9 = scalar_lea.hbm %s1118_s10, 64 }
 0x17b   :  { %p822_p5 = scmp.ne.s32.totalorder %s1118_s10, %s821_s9  ;;  %p825_p6 = scmp.lt.u32.totalorder %s821_s9, %s1118_s10 }
 0x17d   :  { %p827_p7 = pnand %p825_p6, %p822_p5 }
 0x17f   :  { %830 = shalt.err (!%p827_p7)
}
 0x180   :  { %478 = dma.vmem_to_hbm [thread:$0]  %s476_s22, 64, %s1118_s10, [#allocation15]   ;;  %v522_v45 = vld [vmem:[%s1116_s8] ss:$0 sm:$0xff] }
 0x181   :  { %s877_s18 = smov [#allocation16]  }
 0x182   :  { %v447_v46 = vpop.f32.mrb[4].mxu0  ;;  %s485_s12 = sshll.u32 %s877_s18, 4  ;;  %s486_s12 = int_to_ptr.vmem [resolvable:$true] %s485_s12 }
 0x183   :  { %v448_v47 = vadd.f32 %v522_v45, %v447_v46  ;;  %v616_v48 = vpop.f32.mrb[5].mxu0  ;;  %s831_s13 = scalar_lea.vmem %s486_s12, 64  ;;  %p836_p9 = scmp.lt.s32.totalorder %s486_s12, %s486_s12 }
 0x184   :  { %v450_v49 = vpop.f32.mrb[6].mxu0  ;;  %p832_p8 = scmp.ne.s32.totalorder %s486_s12, %s831_s13  ;;  %p837_p10 = scmp.lt.s32.totalorder %s831_s13, %s831_s13 }
 0x185   :  { %v457_v50 = vpack.c.bf16 %v448_v47, %v448_v47  ;;  %v617_v51 = vpop.f32.mrb[7].mxu0 }
 0x186   :  { %p838_p11 = por %p837_p10, %p836_p9 }
 0x187   :  { %458 = vst [vmem:[#allocation16] sm:$0xf] %v457_v50 }
 0x188   :  { %p839_p12 = pnand %p838_p11, %p832_p8 }
 0x18a   :  { %842 = shalt.err (!%p839_p12)
}
 0x18b   :  { %s843_s8 = scalar_lea.hbm %s1119_s11, 64 }
 0x18c   :  { %p844_p13 = scmp.ne.s32.totalorder %s1119_s11, %s843_s8  ;;  %p847_p0 = scmp.lt.u32.totalorder %s843_s8, %s1119_s11 }
 0x18e   :  { %p849_p1 = pnand %p847_p0, %p844_p13 }
 0x190   :  { %852 = shalt.err (!%p849_p1)
}
 0x191   :  { %488 = dma.vmem_to_hbm [thread:$0]  %s486_s12, 64, %s1119_s11, [#allocation15]  }
 0x192   :  { %861 = dma.done.wait [#allocation4], 64  }
 0x193   :  { %862 = vsyncadd [#allocation4], 4294967232 }
 0x194   :  { %863 = dma.done.wait [#allocation15], 128  }
 0x195   :  { %864 = vsyncadd [#allocation15], 4294967168 }
 0x196   :  { %498 = vsyncpa [#allocation3], 1 }
 0x197   :  { %499 = vsyncpa [#allocation6], 1 }
 0x198   :  { %500 = vsyncpa [#allocation9], 1 }
 0x199   :  { %501 = vsyncpa [#allocation12], 1 }
 0x19a   :  { %502 = vsyncpa [#allocation4], 1 }
 0x19b   :  { %503 = vsyncpa [#allocation15], 1 }

</bundles_post_ra>
